<compile_context>
chip_gen: v6e
topology: v6e:2x2x1
jax: 0.10.0
libtpu: 0.0.40
codegen_flags: <defaults>
</compile_context>

<pallas_src>
import functools

import jax
import jax.numpy as jnp
from jax import lax
from jax.experimental import pallas as pl
from jax.experimental.pallas import tpu as pltpu


# ---------------------------------------------------------------------------
# Small helpers
# ---------------------------------------------------------------------------
def _round_up(x, m):
    return ((x + m - 1) // m) * m


def _row_align(dtype):
    """Minimum row-tile multiple so sublane packing stays full."""
    itemsize = jnp.dtype(dtype).itemsize
    if itemsize >= 4:
        return 8
    if itemsize == 2:
        return 16
    return 32


def _physical_vmem_bytes():
    """Per-TensorCore VMEM of the running chip; conservative fallback."""
    try:
        info = pltpu.get_tpu_info()
        v = getattr(info, "vmem_capacity_bytes", None)
        if v:
            return int(v)
    except Exception:
        pass
    return 64 << 20  # v7x per-core VMEM: safe lower bound everywhere


def _pick_tm(rows, d_pad, dtype, vmem_bytes):
    """Largest row tile that fits (double-buffered) in roughly half of VMEM."""
    align = _row_align(dtype)
    nbytes = jnp.dtype(dtype).itemsize
    # double-buffered input tile + double-buffered output tile + ~2 f32 temps
    bytes_per_row = d_pad * (2 * nbytes + 2 * nbytes + 2 * 4)
    budget = vmem_bytes // 2
    tm = (budget // bytes_per_row) // align * align
    tm = max(align, min(1024, tm))
    # never bigger than the (aligned) number of rows
    tm = min(tm, _round_up(rows, align))
    # keep >= 2 grid steps when possible so both v7x TensorCores get work
    if rows >= 2 * align:
        tm = min(tm, _round_up(pl.cdiv(rows, 2), align))
    return tm


# ---------------------------------------------------------------------------
# Kernel (specialized on norm kind and affine configuration)
# ---------------------------------------------------------------------------
def _norm_kernel(*refs, kind, eps, d_valid, has_w, has_b):
    x_ref = refs[0]
    o_ref = refs[-1]
    idx = 1
    w_ref = None
    b_ref = None
    if has_w:
        w_ref = refs[idx]
        idx += 1
    if has_b:
        b_ref = refs[idx]
        idx += 1

    inv_d = jnp.float32(1.0 / d_valid)
    x = x_ref[...].astype(jnp.float32)                     # (TM, Dp)

    if kind == "layer":
        # Fused single-pass statistics: sum and sum-of-squares.
        s1 = jnp.sum(x, axis=-1, keepdims=True)
        s2 = jnp.sum(x * x, axis=-1, keepdims=True)
        mean = s1 * inv_d
        var = s2 * inv_d - mean * mean                     # biased variance
        y = (x - mean) * lax.rsqrt(var + eps)
        if has_w:
            y = y * w_ref[...].astype(jnp.float32)
        if has_b:
            y = y + b_ref[...].astype(jnp.float32)
        o_ref[...] = y.astype(o_ref.dtype)
    else:  # "rms"
        og = o_ref.dtype
        ms = jnp.sum(x * x, axis=-1, keepdims=True) * inv_d
        # Cast back to original dtype BEFORE the affine (matches torch code).
        y = (x * lax.rsqrt(ms + eps)).astype(og)
        if has_w:
            y = w_ref[...].astype(og) * y
        if has_b:
            y = y + b_ref[...].astype(og)
        o_ref[...] = y.astype(og)


# ---------------------------------------------------------------------------
# Wrapper
# ---------------------------------------------------------------------------
def _run_norm(kind, x, weight, bias, eps):
    """x: (..., D). weight/bias: (D,) or None. Returns x.shape / x.dtype."""
    orig_shape = x.shape
    d = orig_shape[-1]
    rows = 1
    for s in orig_shape[:-1]:
        rows *= s
    x2 = x.reshape(rows, d)

    d_pad = _round_up(d, 128)          # lane-dense tiles / unmasked stores
    vmem = _physical_vmem_bytes()
    tm = _pick_tm(rows, d_pad, x.dtype, vmem)
    rows_pad = _round_up(rows, tm)

    if d_pad != d or rows_pad != rows:
        x2 = jnp.pad(x2, ((0, rows_pad - rows), (0, d_pad - d)))

    has_w = weight is not None
    has_b = bias is not None

    operands = [x2]
    in_specs = [pl.BlockSpec((tm, d_pad), lambda i: (i, 0))]
    if has_w:
        w2 = weight.reshape(1, d)
        if d_pad != d:
            w2 = jnp.pad(w2, ((0, 0), (0, d_pad - d)))
        operands.append(w2)
        in_specs.append(pl.BlockSpec((1, d_pad), lambda i: (0, 0)))
    if has_b:
        b2 = bias.reshape(1, d)
        if d_pad != d:
            b2 = jnp.pad(b2, ((0, 0), (0, d_pad - d)))
        operands.append(b2)
        in_specs.append(pl.BlockSpec((1, d_pad), lambda i: (0, 0)))

    # VMEM budget: double-buffered in/out tiles + params + f32 intermediates.
    nbytes = jnp.dtype(x.dtype).itemsize
    footprint = (2 * tm * d_pad * (nbytes + nbytes)
                 + 4 * d_pad * nbytes
                 + 3 * tm * d_pad * 4)
    vmem_limit = int(min(int(vmem * 0.9), max(footprint, 32 << 20)))

    kernel = functools.partial(
        _norm_kernel, kind=kind, eps=float(eps), d_valid=d,
        has_w=has_w, has_b=has_b)

    out = pl.pallas_call(
        kernel,
        out_shape=jax.ShapeDtypeStruct((rows_pad, d_pad), x.dtype),
        grid_spec=pltpu.PrefetchScalarGridSpec(
            num_scalar_prefetch=0,
            grid=(rows_pad // tm,),
            in_specs=in_specs,
            out_specs=pl.BlockSpec((tm, d_pad), lambda i: (i, 0)),
        ),
        compiler_params=pltpu.CompilerParams(
            dimension_semantics=("parallel",),
            vmem_limit_bytes=vmem_limit),
    )(*operands)

    out = out[:rows, :d]
    return out.reshape(orig_shape)


def layer_norm(x, weight=None, bias=None, eps=1e-5):
    """Equivalent of OLMo LayerNorm.forward (F.layer_norm over last dim)."""
    return _run_norm("layer", x, weight, bias, eps)


def rms_layer_norm(x, weight=None, bias=None, eps=1e-5):
    """Equivalent of OLMo RMSLayerNorm.forward (f32 compute, affine in og dtype)."""
    # Matches torch: bias only applied when weight is present.
    if weight is None:
        bias = None
    return _run_norm("rms", x, weight, bias, eps)


# ---------------------------------------------------------------------------
# Pure-JAX references for validation
# ---------------------------------------------------------------------------
def _ref_layer_norm(x, w, b, eps):
    xf = x.astype(jnp.float32)
    mean = jnp.mean(xf, axis=-1, keepdims=True)
    var = jnp.mean((xf - mean) ** 2, axis=-1, keepdims=True)
    y = (xf - mean) * lax.rsqrt(var + eps)
    if w is not None:
        y = y * w.astype(jnp.float32)
    if b is not None:
        y = y + b.astype(jnp.float32)
    return y.astype(x.dtype)


def _ref_rms_norm(x, w, b, eps):
    xf = x.astype(jnp.float32)
    var = jnp.mean(xf * xf, axis=-1, keepdims=True)
    y = (xf * lax.rsqrt(var + eps)).astype(x.dtype)
    if w is not None:
        y = w.astype(x.dtype) * y
        if b is not None:
            y = y + b.astype(x.dtype)
    return y.astype(x.dtype)


if __name__ == "__main__":
    key = jax.random.PRNGKey(0)
    eps = 1e-5

    # Case 1: f32, full affine (weight=ones, bias=zeros as in reset_parameters).
    batch, seq, d_model = 2, 8, 128
    k1, k2, k3 = jax.random.split(key, 3)
    x = jax.random.normal(k1, (batch, seq, d_model), dtype=jnp.float32)
    weight = jnp.ones((d_model,), dtype=jnp.float32)
    bias = jnp.zeros((d_model,), dtype=jnp.float32)

    y_ln = layer_norm(x, weight, bias, eps)
    y_rms = rms_layer_norm(x, weight, bias, eps)
    jax.block_until_ready(y_ln)
    jax.block_until_ready(y_rms)
    assert y_ln.shape == x.shape and y_ln.dtype == x.dtype
    assert y_rms.shape == x.shape and y_rms.dtype == x.dtype
    assert jnp.allclose(y_ln, _ref_layer_norm(x, weight, bias, eps),
                        atol=1e-5, rtol=1e-5)
    assert jnp.allclose(y_rms, _ref_rms_norm(x, weight, bias, eps),
                        atol=1e-5, rtol=1e-5)

    # Case 2: bf16, scale-only affine, ragged rows / non-128 d_model
    # (exercises the row / lane padding paths).
    xb = jax.random.normal(k2, (2, 5, 96), dtype=jnp.float32).astype(jnp.bfloat16)
    wb = (1.0 + 0.1 * jax.random.normal(k3, (96,), dtype=jnp.float32)
          ).astype(jnp.bfloat16)
    yb_ln = layer_norm(xb, wb, None, eps)
    yb_rms = rms_layer_norm(xb, wb, None, eps)
    jax.block_until_ready(yb_ln)
    jax.block_until_ready(yb_rms)
    assert yb_ln.shape == xb.shape and yb_ln.dtype == xb.dtype
    assert yb_rms.shape == xb.shape and yb_rms.dtype == xb.dtype
    assert jnp.allclose(yb_ln.astype(jnp.float32),
                        _ref_layer_norm(xb, wb, None, eps).astype(jnp.float32),
                        atol=3e-2, rtol=3e-2)
    assert jnp.allclose(yb_rms.astype(jnp.float32),
                        _ref_rms_norm(xb, wb, None, eps).astype(jnp.float32),
                        atol=3e-2, rtol=3e-2)

    # Case 3: f32, no elementwise affine (weight=None, bias=None).
    xc = jax.random.normal(k2, (3, 7, 192), dtype=jnp.float32)
    yc_ln = layer_norm(xc, None, None, eps)
    yc_rms = rms_layer_norm(xc, None, None, eps)
    jax.block_until_ready(yc_ln)
    jax.block_until_ready(yc_rms)
    assert jnp.allclose(yc_ln, _ref_layer_norm(xc, None, None, eps),
                        atol=1e-5, rtol=1e-5)
    assert jnp.allclose(yc_rms, _ref_rms_norm(xc, None, None, eps),
                        atol=1e-5, rtol=1e-5)

    print("KERNEL_OK")
</pallas_src>

<mosaic_0001>
module attributes {stable_mosaic.version = 11 : i64} {
  func.func @_norm_kernel(%arg0: i32, %arg1: memref<8x128xf32, #tpu.memory_space<vmem>>, %arg2: memref<1x128xf32, #tpu.memory_space<vmem>>, %arg3: memref<1x128xf32, #tpu.memory_space<vmem>>, %arg4: memref<8x128xf32, #tpu.memory_space<vmem>>) attributes {dimension_semantics = [#tpu.dimension_semantics<parallel>], iteration_bounds = array<i64: 2>, scalar_prefetch = 0 : i64, scratch_operands = 0 : i64, tpu.core_type = #tpu.core_type<tc>, window_params = [{transform_indices = @transform_0, window_bounds = array<i64: 8, 128>}, {pipeline_mode = #tpu.pipeline_mode<synchronous>, transform_indices = @transform_1, window_bounds = array<i64: 1, 128>}, {pipeline_mode = #tpu.pipeline_mode<synchronous>, transform_indices = @transform_2, window_bounds = array<i64: 1, 128>}, {transform_indices = @transform_3, window_bounds = array<i64: 8, 128>}]} {
    %c0 = arith.constant 0 : index
    %c0_0 = arith.constant 0 : index
    %0 = vector.load %arg1[%c0, %c0_0] : memref<8x128xf32, #tpu.memory_space<vmem>>, vector<8x128xf32>
    %cst = arith.constant dense<0.000000e+00> : vector<8xf32>
    %1 = vector.multi_reduction <add>, %0, %cst [1] : vector<8x128xf32> to vector<8xf32>
    %2 = vector.shape_cast %1 : vector<8xf32> to vector<8x1xf32>
    %3 = arith.mulf %0, %0 : vector<8x128xf32>
    %cst_1 = arith.constant dense<0.000000e+00> : vector<8xf32>
    %4 = vector.multi_reduction <add>, %3, %cst_1 [1] : vector<8x128xf32> to vector<8xf32>
    %5 = vector.shape_cast %4 : vector<8xf32> to vector<8x1xf32>
    %cst_2 = arith.constant 7.812500e-03 : f32
    %6 = vector.broadcast %cst_2 : f32 to vector<8x1xf32>
    %7 = arith.mulf %2, %6 : vector<8x1xf32>
    %cst_3 = arith.constant 7.812500e-03 : f32
    %8 = vector.broadcast %cst_3 : f32 to vector<8x1xf32>
    %9 = arith.mulf %5, %8 : vector<8x1xf32>
    %10 = arith.mulf %7, %7 : vector<8x1xf32>
    %11 = arith.subf %9, %10 : vector<8x1xf32>
    %12 = vector.broadcast %7 : vector<8x1xf32> to vector<8x128xf32>
    %13 = arith.subf %0, %12 : vector<8x128xf32>
    %cst_4 = arith.constant 9.99999974E-6 : f32
    %14 = vector.broadcast %cst_4 : f32 to vector<8x1xf32>
    %15 = arith.addf %11, %14 : vector<8x1xf32>
    %16 = math.rsqrt %15 : vector<8x1xf32>
    %17 = vector.broadcast %16 : vector<8x1xf32> to vector<8x128xf32>
    %18 = arith.mulf %13, %17 : vector<8x128xf32>
    %c0_5 = arith.constant 0 : index
    %c0_6 = arith.constant 0 : index
    %19 = vector.load %arg2[%c0_5, %c0_6] : memref<1x128xf32, #tpu.memory_space<vmem>>, vector<1x128xf32>
    %20 = vector.broadcast %19 : vector<1x128xf32> to vector<8x128xf32>
    %21 = arith.mulf %18, %20 : vector<8x128xf32>
    %c0_7 = arith.constant 0 : index
    %c0_8 = arith.constant 0 : index
    %22 = vector.load %arg3[%c0_7, %c0_8] : memref<1x128xf32, #tpu.memory_space<vmem>>, vector<1x128xf32>
    %23 = vector.broadcast %22 : vector<1x128xf32> to vector<8x128xf32>
    %24 = arith.addf %21, %23 : vector<8x128xf32>
    %c0_9 = arith.constant 0 : index
    %c0_10 = arith.constant 0 : index
    %25 = vector.load %arg4[%c0_9, %c0_10] : memref<8x128xf32, #tpu.memory_space<vmem>>, vector<8x128xf32>
    tpu.vector_store %arg4[%c0_9, %c0_10], %24 {strides = array<i32>} : memref<8x128xf32, #tpu.memory_space<vmem>>, vector<8x128xf32>,
    return
  }
  func.func @transform_0(%arg0: i32) -> (i32, i32) {
    %c0_i32 = arith.constant 0 : i32
    %c0_i32_0 = arith.constant 0 : i32
    return %arg0, %c0_i32 : i32, i32
  }
  func.func @transform_1(%arg0: i32) -> (i32, i32) {
    %c0_i32 = arith.constant 0 : i32
    %c0_i32_0 = arith.constant 0 : i32
    %c0_i32_1 = arith.constant 0 : i32
    return %c0_i32, %c0_i32_0 : i32, i32
  }
  func.func @transform_2(%arg0: i32) -> (i32, i32) {
    %c0_i32 = arith.constant 0 : i32
    %c0_i32_0 = arith.constant 0 : i32
    %c0_i32_1 = arith.constant 0 : i32
    return %c0_i32, %c0_i32_0 : i32, i32
  }
  func.func @transform_3(%arg0: i32) -> (i32, i32) {
    %c0_i32 = arith.constant 0 : i32
    %c0_i32_0 = arith.constant 0 : i32
    return %arg0, %c0_i32 : i32, i32
  }
}

</mosaic_0001>

<bundles_post_ra>
// kernel: tpu_custom_call.1
= control target key start
LH: loop header
LB: loop body
LE: loop exit
PB: predicated region body
PF: predicated region fallthrough
CT: control target
= control target key end

     0   :  { %8 = vsyncpa [#allocation3], 0  ;;  %s626_s0 = inlined_call_operand.hbm [shape: f32[16,128], index: 0, kind: input, shape index: {}]   ;;  %s627_s1 = inlined_call_operand.vmem [shape: f32[1,128], index: 1, kind: input, shape index: {}]   ;;  %s628_s2 = inlined_call_operand.vmem [shape: f32[1,128], index: 2, kind: input, shape index: {}]   ;;  %s629_s3 = inlined_call_operand.hbm [shape: f32[16,128], index: 3, kind: output, shape index: {}]  }
   0x1   :  { %10 = vsyncpa [#allocation3 + $0x1], 0 }
   0x2   :  { %11 = vsyncpa [#allocation4], 0 }
   0x3   :  { %13 = vsyncpa [#allocation4 + $0x1], 0  ;;  %s479_s12 = smov 0   ;;  %s481_s13 = smov 0  }
   0x4   :  { %s483_s14 = smov 0   ;;  %s485_s15 = smov 0  }
   0x5 LB: > { %s500_s16 = sadd.s32 4294967295, %s455_s15   ;;  %s301_s17 = sadd.s32 4294967294, %s455_s15   ;;  %s455_s15 = sphi %s485_s15, %s646_s15   ;;  %s451_s14 = sphi %s483_s14, %s645_s14   ;;  %s447_s13 = sphi %s481_s13, %s644_s13   ;;  %s443_s12 = sphi %s479_s12, %s643_s12  }
   0x6   : > { %s504_s18 = sadd.s32 1, %s455_s15   ;;  %s26_s19 = sadd.s32 1, %s451_s14 }
   0x7   : > { %s23_s20 = ssub.s32 %s455_s15, %s504_s18  ;;  %p33_p0 = scmp.ne.s32.totalorder %s451_s14, %s447_s13 }
   0x8   : > { %p24_p1 = scmp.eq.s32.totalorder %s23_s20, 0  ;;  %p34_p2 = scmp.eq.s32.totalorder %s455_s15, 0 }
   0x9   : > { %p39_p3 = scmp.ne.s32.totalorder %s447_s13, %s443_s12  ;;  %p40_p4 = scmp.eq.s32.totalorder %s500_s16, 0 }
   0xa   : > { %s516_s21 = scalar_select %p24_p1, %s451_s14, %s26_s19  }
   0xb   : > { %p518_p5 = por %p34_p2, %p33_p0  ;;  %p522_p6 = por %p40_p4, %p39_p3 }
   0xc   : > { %p105_p7 = scmp.eq.s32.totalorder %s500_s16, 1  ;;  %p111_p8 = scmp.eq.s32.totalorder %s301_s17, 1 }
   0xd   : > { %s633_s23 = scalar_select %p522_p6, 1, 0 }
   0xe   : > { %p327_p10 = scmp.lt.s32.totalorder %s455_s15, 2  ;;  %p529_p11 = por %p105_p7, %p33_p0 }
   0xf   : > { %p533_p12 = por %p111_p8, %p39_p3  ;;  %s137_s26 = sand.u32 1, %s451_s14  }
  0x10   : > { %s634_s24 = scalar_select %p529_p11, 1, 0 }
  0x11   : > { %s635_s25 = scalar_select %p533_p12, 1, 0 }
  0x12   : > { %s305_s27 = sshll.u32 %s455_s15, 7  ;;  %s304_s28 = sshll.u32 %s137_s26, 3 }
  0x13   : > { %s542_s4 = scalar_lea.hbm %s626_s0, %s305_s27  ;;  %s141_s5 = scalar_lea.vmem [#allocation2], %s304_s28 }
  0x14   : > { %s148_s6 = sshll.u32 %s141_s5, 4  ;;  %p546_p13 = pnand %p327_p10, %p518_p5  ;;  %s550_s6 = int_to_ptr.vmem [resolvable:$true] %s148_s6 }
  0x15   : > { %s138_s8 = scalar_lea.sflag [#allocation3], %s137_s26  ;;  %s363_s9 = scalar_lea.hbm %s542_s4, 128 }
  0x16   : > { %p364_p2 = scmp.ne.s32.totalorder %s542_s4, %s363_s9  ;;  %p365_p3 = pneg %p546_p13 }
  0x17   : > { %s368_s17 = scalar_lea.hbm %s626_s0, 256  ;;  %p369_p5 = scmp.lt.s32.totalorder %s542_s4, %s626_s0 }
  0x18   : > { %p366_p4 = pnand %p365_p3, %p364_p2  ;;  %p370_p8 = scmp.lt.s32.totalorder %s368_s17, %s363_s9 }
  0x1a   : > { %p367_p7 = pneg %p366_p4  ;;  %p371_p10 = por %p370_p8, %p369_p5 }
  0x1c   : > { %p372_p9 = pnand %p371_p10, %p367_p7 }
  0x1e   : > { %375 = shalt.err (!%p372_p9)
}
  0x1f   : > { %s376_s22 = scalar_lea.vmem %s550_s6, 128  ;;  %s457_s26 = smov [#allocation2]  }
  0x20   : > { %p377_p0 = scmp.ne.s32.totalorder %s550_s6, %s376_s22  ;;  %s381_s27 = sshll.u32 %s457_s26, 4  ;;  %s382_s27 = int_to_ptr.vmem [resolvable:$false] %s381_s27 }
  0x21   : > { %s383_s28 = scalar_lea.vmem %s382_s27, 256  ;;  %p384_p4 = scmp.lt.s32.totalorder %s550_s6, %s382_s27 }
  0x22   : > { %p379_p1 = pnand %p377_p0, %p365_p3  ;;  %p385_p12 = scmp.lt.s32.totalorder %s383_s28, %s376_s22 }
  0x24   : > { %p380_p2 = pneg %p379_p1  ;;  %p386_p11 = por %p385_p12, %p384_p4 }
  0x26   : > { %p387_p6 = pnand %p386_p11, %p380_p2 }
  0x28   : > { %390 = shalt.err (!%p387_p6)
}
  0x29   : > { %322 = dma.hbm_to_vmem [thread:$0]  (!%p546_p13), %s542_s4, 128, %s550_s6, %s138_s8  }
  0x2a   : > { %p637_p9 = scmp.lt.s32.totalorder %s455_s15, 3  ;;  %p638_p7 = scmp.ge.s32.totalorder %s455_s15, 1 }
  0x2c   : > { %p154_p0 = pnand %p638_p7, %p637_p9 }
  0x2d   : > { %s577_s29 = sand.u32 (!%p154_p0), 1, %s447_s13   ;;  %p639_p6 = scmp.ne.s32.totalorder (!%p154_p0), %s633_s23, 0 }
  0x2e   : > { %157 = sbr.rel (%p154_p0) target bundleno = 234 (0xea), region = 32  ;;  %s307_s30 = sshll.u32 (!%p154_p0), %s577_s29, 3 }
  0x2f   : > { %s160_s5 = scalar_lea.sflag (!%p154_p0), [#allocation3], %s577_s29  ;;  %s163_s9 = scalar_lea.vmem (!%p154_p0), [#allocation2], %s307_s30 }
  0x33   : > { %434 = dma.done.wait (%p639_p6), %s160_s5, 128  }
  0x34   : > { %436 = vsyncadd (%p639_p6), %s160_s5, 4294967168  ;;  %v186_v0 = vld [vmem:[%s163_s9] sm:$0xff]  ;;  %s312_s8 = sshll.u32 %s500_s16, 7  ;;  %s185_s10 = scalar_lea.vmem [#allocation5], %s307_s30 }
  0x35   : > { %187 = vadd.xlane.f32.xlu0 %v186_v0  ;;  %v189_v1 = vmul.f32 %v186_v0, %v186_v0  ;;  %v309_v11 = vld [vmem:[%s627_s1] ss:$0 sm:$0xff]  ;;  %s231_s11 = sshll.u32 %s185_s10, 4  ;;  %s229_s20 = scalar_lea.hbm %s629_s3, %s312_s8  ;;  %s232_s11 = int_to_ptr.vmem [resolvable:$true] %s231_s11 }
  0x36   : > { %v310_v13 = vld [vmem:[%s628_s2] ss:$0 sm:$0xff]  ;;  %s218_s22 = scalar_lea.sflag [#allocation4], %s577_s29  ;;  %s391_s26 = scalar_lea.vmem %s232_s11, 128 }
  0x37   : > { %p392_p11 = scmp.ne.s32.totalorder %s232_s11, %s391_s26  ;;  %p640_p12 = scmp.ne.s32.totalorder %s634_s24, 0 }
  0x38   : > { %s458_s27 = smov [#allocation5]  }
  0x39   : > { %190 = vadd.xlane.f32.xlu0 %v189_v1  ;;  %p393_p13 = pnand %p392_p11, %p640_p12  ;;  %s395_s28 = sshll.u32 %s458_s27, 4  ;;  %s396_s28 = int_to_ptr.vmem [resolvable:$false] %s395_s28 }
  0x3a   : > { %s397_s16 = scalar_lea.vmem %s396_s28, 256  ;;  %p398_p3 = scmp.lt.s32.totalorder %s232_s11, %s396_s28 }
  0x3b   : > { %p394_p1 = pneg %p393_p13  ;;  %p399_p5 = scmp.lt.s32.totalorder %s397_s16, %s391_s26 }
  0x3d   : > { %p400_p8 = por %p399_p5, %p398_p3 }
  0x3f   : > { %p401_p10 = pnand %p400_p8, %p394_p1 }
  0xbe   : > { %v188_v2 = vpop.xlane.xlu0 %187 }
  0xbf   : > { %v192_v3 = vmul.f32 0.0078125, %v188_v2 }
  0xc1   : > { %v194_v5 = vmul.f32 %v192_v3, %v192_v3  ;;  %v196_v9 = vsub.f32 %v186_v0, %v192_v3 }
  0xc2   : > { %v191_v4 = vpop.xlane.xlu0 %190 }
  0xc3   : > { %v193_v6 = vmul.f32 0.0078125, %v191_v4 }
  0xc5   : > { %v195_v7 = vsub.f32 %v193_v6, %v194_v5 }
  0xc7   : > { %v197_v8 = vadd.f32 1e-05, %v195_v7 }
  0xc9   : > { %361 = vrsqrt.f32 %v197_v8 }
  0xd6   : > { %v362_v10 = vpop.eup %361 }
  0xd7   : > { %v199_v12 = vmul.f32 %v362_v10, %v196_v9 }
  0xd9   : > { %v207_v14 = vmul.f32 %v309_v11, %v199_v12 }
  0xdb   : > { %v215_v15 = vadd.f32 %v310_v13, %v207_v14 }
  0xdd   : > { %216 = vst [vmem:[%s185_s10] sm:$0xff] %v215_v15 }
  0xde   : > { %404 = shalt.err (!%p401_p10)
}
  0xdf   : > { %s405_s30 = scalar_lea.hbm %s229_s20, 128  ;;  %s409_s9 = scalar_lea.hbm %s629_s3, 256 }
  0xe0   : > { %p406_p2 = scmp.ne.s32.totalorder %s229_s20, %s405_s30  ;;  %p410_p7 = scmp.lt.s32.totalorder %s229_s20, %s629_s3 }
  0xe1   : > { %p411_p0 = scmp.lt.s32.totalorder %s409_s9, %s405_s30 }
  0xe2   : > { %p407_p4 = pnand %p406_p2, %p640_p12 }
  0xe3   : > { %p412_p6 = por %p411_p0, %p410_p7 }
  0xe4   : > { %p408_p9 = pneg %p407_p4 }
  0xe6   : > { %p413_p11 = pnand %p412_p6, %p408_p9 }
  0xe8   : > { %416 = shalt.err (!%p413_p11)
}
  0xe9   : > { %317 = dma.vmem_to_hbm [thread:$0]  (%p640_p12), %s232_s11, 128, %s229_s20, %s218_s22  }
  0xea PF: > { %s243_s6 = sand.u32 1, %s443_s12   ;;  %p641_p13 = scmp.ne.s32.totalorder %s635_s25, 0 }
  0xeb   : > { %p642_p1 = scmp.ge.s32.totalorder %s455_s15, 2  ;;  %s244_s7 = scalar_lea.sflag [#allocation4], %s243_s6 }
  0xed   : > { %p324_p3 = pnand %p642_p1, %p641_p13 }
  0xef   : > { %p325_p5 = pneg %p324_p3 }
  0xf1   : > { %438 = dma.done.wait (%p325_p5), %s244_s7, 128  }
  0xf2   : > { %440 = vsyncadd (%p325_p5), %s244_s7, 4294967168  ;;  %p16_p8 = scmp.ge.s32.totalorder %s504_s18, 4   ;;  %s643_s12 = smov %s447_s13 }
  0xf3   : > { %s644_s13 = smov %s451_s14  ;;  %s645_s14 = smov %s516_s21 }
  0xf4   : > { %s646_s15 = smov %s504_s18  ;;  %18 = sbr.rel (!%p16_p8) target bundleno = 5 (0x5), region = 77 }
  0xf9   :  { %249 = vsyncpa [#allocation3], 1 }
  0xfa   :  { %251 = vsyncpa [#allocation3 + $0x1], 1 }
  0xfb   :  { %252 = vsyncpa [#allocation4], 1 }
  0xfc   :  { %254 = vsyncpa [#allocation4 + $0x1], 1 }

</bundles_post_ra>
